<compile_context>
chip_gen: v6e
topology: v6e:2x2x1
jax: 0.10.0
libtpu: 0.0.40
codegen_flags: <defaults>
</compile_context>

<pallas_src>
import functools

import jax
import jax.numpy as jnp
from jax.experimental import pallas as pl
from jax.experimental.pallas import tpu as pltpu

LN_EPS = 1e-5                       # nn.LayerNorm default
_X_TILE_BUDGET = 4 << 20            # ~4 MiB per in-flight x tile (v5e/v6e/v7x safe)


# ---------------------------------------------------------------------------
# Kernels
# ---------------------------------------------------------------------------
def _epilogue(pooled, gamma_ref, beta_ref, w_ref, b_ref, out_ref):
    """LayerNorm(H) -> Linear(H, NC) -> Softmax(NC); tiny, runs once per tile."""
    mu = jnp.mean(pooled, axis=-1, keepdims=True)
    var = jnp.mean((pooled - mu) ** 2, axis=-1, keepdims=True)
    normed = (pooled - mu) * jax.lax.rsqrt(var + LN_EPS)
    normed = normed * gamma_ref[...] + beta_ref[...]

    logits = jnp.dot(normed, w_ref[...],
                     preferred_element_type=jnp.float32) + b_ref[...]

    m = jnp.max(logits, axis=-1, keepdims=True)
    e = jnp.exp(logits - m)
    out_ref[...] = (e / jnp.sum(e, axis=-1, keepdims=True)).astype(out_ref.dtype)


def classifier_kernel_fused(x_ref, gamma_ref, beta_ref, w_ref, b_ref, out_ref,
                            *, wc_total):
    # x_ref: (TB, H, WC) whole-sample tile (contiguous HBM read).
    pooled = jnp.sum(x_ref[...].astype(jnp.float32), axis=-1) * (1.0 / wc_total)
    _epilogue(pooled, gamma_ref, beta_ref, w_ref, b_ref, out_ref)


def classifier_kernel_acc(x_ref, gamma_ref, beta_ref, w_ref, b_ref, out_ref,
                          acc_ref, *, wc_total):
    # x_ref: (TB, H, TWC) batch/WC tile; acc_ref: (TB, H) f32 pooling-sum scratch.
    k = pl.program_id(1)

    @pl.when(k == 0)
    def _init():
        acc_ref[...] = jnp.zeros_like(acc_ref)

    acc_ref[...] += jnp.sum(x_ref[...].astype(jnp.float32), axis=-1)

    @pl.when(k == pl.num_programs(1) - 1)
    def _finalize():
        pooled = acc_ref[...] * (1.0 / wc_total)
        _epilogue(pooled, gamma_ref, beta_ref, w_ref, b_ref, out_ref)


# ---------------------------------------------------------------------------
# Tiling
# ---------------------------------------------------------------------------
def _batch_tile_candidates(B):
    """Legal output batch tiles: multiples of 8 dividing B, plus B itself."""
    cands = {B}
    cands.update(d for d in range(8, B, 8) if B % d == 0)
    return sorted(cands)


def _pick_tiles(B, H, WC, itemsize):
    """Return (TB, TWC, split_wc)."""
    per_sample = H * WC * itemsize
    cands = _batch_tile_candidates(B)

    fitting = [d for d in cands if d * per_sample <= _X_TILE_BUDGET]
    if fitting:
        # Whole-sample contiguous reads; grid over batch only.
        # Prefer >= 2 batch blocks so v7x's second TensorCore has work.
        pref = [d for d in fitting if d <= B // 2]
        tb = max(pref) if pref else max(fitting)
        return tb, WC, False

    # A whole-sample batch tile is over budget -> split the W*C axis.
    tb = min(cands)
    if WC % 128 == 0 and WC > 128:
        max_twc = max(128, (_X_TILE_BUDGET // (tb * H * itemsize)) // 128 * 128)
        twc = min(max_twc, WC)
        while WC % twc != 0:
            twc -= 128
        if twc < WC:
            return tb, twc, True

    # TODO(synk): W*C not 128-aligned so the last block dim must be full;
    # splitting H for the pooling pass would bound VMEM here but is not needed
    # for the shapes this module is used with.
    return tb, WC, False


# ---------------------------------------------------------------------------
# Wrapper
# ---------------------------------------------------------------------------
def classifier_forward(x_bhwc, gamma, beta, w, b, *, stream_dtype=None):
    B, H, W, C = x_bhwc.shape
    WC = W * C
    NC = w.shape[-1]

    x_flat = x_bhwc.reshape(B, H, WC)            # glue reshape in plain JAX
    if stream_dtype is not None:
        x_flat = x_flat.astype(stream_dtype)     # e.g. bf16: halves HBM traffic
    gamma2 = gamma.reshape(1, H).astype(jnp.float32)
    beta2 = beta.reshape(1, H).astype(jnp.float32)
    w2 = w.reshape(H, NC).astype(jnp.float32)
    b2 = b.reshape(1, NC).astype(jnp.float32)

    itemsize = jnp.dtype(x_flat.dtype).itemsize
    TB, TWC, split = _pick_tiles(B, H, WC, itemsize)

    # VMEM budgeting from the real buffer inventory (double-buffered x + tiny
    # resident params + double-buffered output + accumulator scratch).
    x_tile_bytes = TB * H * TWC * itemsize
    param_bytes = 2 * (2 * H + H * NC + NC) * 4
    out_bytes = 2 * TB * max(NC, 128) * 4
    acc_bytes = TB * max(H, 128) * 4 if split else 0
    footprint = 2 * x_tile_bytes + param_bytes + out_bytes + acc_bytes
    vmem_limit = int(max(16 << 20, footprint + (4 << 20)))

    cost = pl.CostEstimate(
        flops=int(B * H * WC + 5 * B * H + 2 * B * H * NC + 3 * B * NC),
        transcendentals=int(B * NC),
        bytes_accessed=int(B * H * WC * itemsize
                           + (2 * H + H * NC + NC) * 4
                           + B * NC * 4),
    )

    if split:
        grid = (pl.cdiv(B, TB), pl.cdiv(WC, TWC))
        kernel = functools.partial(classifier_kernel_acc, wc_total=float(WC))
        in_specs = [
            pl.BlockSpec((TB, H, TWC), lambda i, k: (i, 0, k)),   # x tiles
            pl.BlockSpec((1, H), lambda i, k: (0, 0)),            # gamma
            pl.BlockSpec((1, H), lambda i, k: (0, 0)),            # beta
            pl.BlockSpec((H, NC), lambda i, k: (0, 0)),           # w
            pl.BlockSpec((1, NC), lambda i, k: (0, 0)),           # b
        ]
        out_specs = pl.BlockSpec((TB, NC), lambda i, k: (i, 0))
        scratch_shapes = [pltpu.VMEM((TB, H), jnp.float32)]
        dim_sem = ("parallel", "arbitrary")
    else:
        grid = (pl.cdiv(B, TB),)
        kernel = functools.partial(classifier_kernel_fused, wc_total=float(WC))
        in_specs = [
            pl.BlockSpec((TB, H, WC), lambda i: (i, 0, 0)),       # x tiles
            pl.BlockSpec((1, H), lambda i: (0, 0)),               # gamma
            pl.BlockSpec((1, H), lambda i: (0, 0)),               # beta
            pl.BlockSpec((H, NC), lambda i: (0, 0)),              # w
            pl.BlockSpec((1, NC), lambda i: (0, 0)),              # b
        ]
        out_specs = pl.BlockSpec((TB, NC), lambda i: (i, 0))
        scratch_shapes = []
        dim_sem = ("parallel",)

    return pl.pallas_call(
        kernel,
        out_shape=jax.ShapeDtypeStruct((B, NC), jnp.float32),
        grid=grid,
        in_specs=in_specs,
        out_specs=out_specs,
        scratch_shapes=scratch_shapes,
        compiler_params=pltpu.CompilerParams(
            dimension_semantics=dim_sem,
            vmem_limit_bytes=vmem_limit,
        ),
        cost_estimate=cost,
    )(x_flat, gamma2, beta2, w2, b2)


# ---------------------------------------------------------------------------
# Pure-JAX reference (matches the PyTorch module)
# ---------------------------------------------------------------------------
def reference_forward(x_bhwc, gamma, beta, w, b):
    B, H, W, C = x_bhwc.shape
    pooled = jnp.mean(x_bhwc.reshape(B, H, W * C).astype(jnp.float32), axis=-1)
    mu = jnp.mean(pooled, axis=-1, keepdims=True)
    var = jnp.mean((pooled - mu) ** 2, axis=-1, keepdims=True)
    normed = (pooled - mu) / jnp.sqrt(var + LN_EPS) * gamma + beta
    logits = normed @ w + b
    return jax.nn.softmax(logits, axis=1)


if __name__ == "__main__":
    # H (dim 1) plays the role of input_dim: input_dim = H = 32, num_classes = 6.
    B, H, W, C = 2, 32, 8, 4
    INPUT_DIM, NUM_CLASSES = H, 6

    key = jax.random.PRNGKey(0)
    kx, kg, kbeta, kw, kb = jax.random.split(key, 5)

    x = jax.random.normal(kx, (B, H, W, C), dtype=jnp.float32)
    gamma = 1.0 + 0.05 * jax.random.normal(kg, (INPUT_DIM,), jnp.float32)
    beta = 0.05 * jax.random.normal(kbeta, (INPUT_DIM,), jnp.float32)
    w = jax.random.uniform(kw, (INPUT_DIM, NUM_CLASSES), jnp.float32,
                           minval=-0.1, maxval=0.1)
    b = jax.random.uniform(kb, (NUM_CLASSES,), jnp.float32,
                           minval=-0.1, maxval=0.1)

    ref = reference_forward(x, gamma, beta, w, b)

    # f32 streaming path: bit-faithful to the PyTorch module.
    out = jax.block_until_ready(classifier_forward(x, gamma, beta, w, b))
    assert out.shape == (B, NUM_CLASSES)
    assert jnp.allclose(out, ref, atol=1e-5, rtol=1e-5), (out, ref)
    assert jnp.allclose(jnp.sum(out, axis=1), 1.0, atol=1e-5)

    # bf16 streaming path (recommended production config: halves HBM bytes;
    # per-element bf16 rounding before the f32 pooling sum -> looser tolerance).
    out_bf16 = jax.block_until_ready(
        classifier_forward(x, gamma, beta, w, b, stream_dtype=jnp.bfloat16))
    assert out_bf16.shape == (B, NUM_CLASSES)
    assert jnp.allclose(out_bf16, ref, atol=3e-2, rtol=3e-2), (out_bf16, ref)

    print("KERNEL_OK")
</pallas_src>

<mosaic_0001>
module attributes {stable_mosaic.version = 11 : i64} {
  func.func @classifier_kernel_fused(%arg0: i32, %arg1: memref<2x32x32xf32, #tpu.memory_space<vmem>>, %arg2: memref<1x32xf32, #tpu.memory_space<vmem>>, %arg3: memref<1x32xf32, #tpu.memory_space<vmem>>, %arg4: memref<32x6xf32, #tpu.memory_space<vmem>>, %arg5: memref<1x6xf32, #tpu.memory_space<vmem>>, %arg6: memref<2x6xf32, #tpu.memory_space<vmem>>) attributes {dimension_semantics = [#tpu.dimension_semantics<parallel>], iteration_bounds = array<i64: 1>, scalar_prefetch = 0 : i64, scratch_operands = 0 : i64, tpu.core_type = #tpu.core_type<tc>, window_params = [{transform_indices = @transform_0, window_bounds = array<i64: 2, 32, 32>}, {pipeline_mode = #tpu.pipeline_mode<synchronous>, transform_indices = @transform_1, window_bounds = array<i64: 1, 32>}, {pipeline_mode = #tpu.pipeline_mode<synchronous>, transform_indices = @transform_2, window_bounds = array<i64: 1, 32>}, {pipeline_mode = #tpu.pipeline_mode<synchronous>, transform_indices = @transform_3, window_bounds = array<i64: 32, 6>}, {pipeline_mode = #tpu.pipeline_mode<synchronous>, transform_indices = @transform_4, window_bounds = array<i64: 1, 6>}, {transform_indices = @transform_5, window_bounds = array<i64: 2, 6>}]} {
    %c0 = arith.constant 0 : index
    %c0_0 = arith.constant 0 : index
    %c0_1 = arith.constant 0 : index
    %0 = vector.load %arg1[%c0, %c0_0, %c0_1] : memref<2x32x32xf32, #tpu.memory_space<vmem>>, vector<2x32x32xf32>
    %cst = arith.constant dense<0.000000e+00> : vector<2x32xf32>
    %1 = vector.multi_reduction <add>, %0, %cst [2] : vector<2x32x32xf32> to vector<2x32xf32>
    %cst_2 = arith.constant 3.125000e-02 : f32
    %2 = vector.broadcast %cst_2 : f32 to vector<2x32xf32>
    %3 = arith.mulf %1, %2 : vector<2x32xf32>
    %cst_3 = arith.constant dense<0.000000e+00> : vector<2xf32>
    %4 = vector.multi_reduction <add>, %3, %cst_3 [1] : vector<2x32xf32> to vector<2xf32>
    %5 = vector.shape_cast %4 : vector<2xf32> to vector<2x1xf32>
    %cst_4 = arith.constant 3.200000e+01 : f32
    %6 = vector.broadcast %cst_4 : f32 to vector<2x1xf32>
    %7 = arith.divf %5, %6 : vector<2x1xf32>
    %8 = vector.broadcast %7 : vector<2x1xf32> to vector<2x32xf32>
    %9 = arith.subf %3, %8 : vector<2x32xf32>
    %10 = arith.mulf %9, %9 : vector<2x32xf32>
    %cst_5 = arith.constant dense<0.000000e+00> : vector<2xf32>
    %11 = vector.multi_reduction <add>, %10, %cst_5 [1] : vector<2x32xf32> to vector<2xf32>
    %12 = vector.shape_cast %11 : vector<2xf32> to vector<2x1xf32>
    %cst_6 = arith.constant 3.200000e+01 : f32
    %13 = vector.broadcast %cst_6 : f32 to vector<2x1xf32>
    %14 = arith.divf %12, %13 : vector<2x1xf32>
    %15 = vector.broadcast %7 : vector<2x1xf32> to vector<2x32xf32>
    %16 = arith.subf %3, %15 : vector<2x32xf32>
    %cst_7 = arith.constant 9.99999974E-6 : f32
    %17 = vector.broadcast %cst_7 : f32 to vector<2x1xf32>
    %18 = arith.addf %14, %17 : vector<2x1xf32>
    %19 = math.rsqrt %18 : vector<2x1xf32>
    %20 = vector.broadcast %19 : vector<2x1xf32> to vector<2x32xf32>
    %21 = arith.mulf %16, %20 : vector<2x32xf32>
    %c0_8 = arith.constant 0 : index
    %c0_9 = arith.constant 0 : index
    %22 = vector.load %arg2[%c0_8, %c0_9] : memref<1x32xf32, #tpu.memory_space<vmem>>, vector<1x32xf32>
    %23 = vector.broadcast %22 : vector<1x32xf32> to vector<2x32xf32>
    %24 = arith.mulf %21, %23 : vector<2x32xf32>
    %c0_10 = arith.constant 0 : index
    %c0_11 = arith.constant 0 : index
    %25 = vector.load %arg3[%c0_10, %c0_11] : memref<1x32xf32, #tpu.memory_space<vmem>>, vector<1x32xf32>
    %26 = vector.broadcast %25 : vector<1x32xf32> to vector<2x32xf32>
    %27 = arith.addf %24, %26 : vector<2x32xf32>
    %c0_12 = arith.constant 0 : index
    %c0_13 = arith.constant 0 : index
    %28 = vector.load %arg4[%c0_12, %c0_13] : memref<32x6xf32, #tpu.memory_space<vmem>>, vector<32x6xf32>
    %cst_14 = arith.constant dense<0.000000e+00> : vector<2x6xf32>
    %29 = tpu.matmul %27, %28, %cst_14 {dimension_numbers = #tpu.dot_dimension_numbers<[1], [0], [0], [1], [0, 0, 1, 1], [], []>} : vector<2x32xf32>, vector<32x6xf32>, vector<2x6xf32> -> vector<2x6xf32>
    %c0_15 = arith.constant 0 : index
    %c0_16 = arith.constant 0 : index
    %30 = vector.load %arg5[%c0_15, %c0_16] : memref<1x6xf32, #tpu.memory_space<vmem>>, vector<1x6xf32>
    %31 = vector.broadcast %30 : vector<1x6xf32> to vector<2x6xf32>
    %32 = arith.addf %29, %31 : vector<2x6xf32>
    %cst_17 = arith.constant dense<0xFF800000> : vector<2xf32>
    %33 = vector.multi_reduction <maximumf>, %32, %cst_17 [1] : vector<2x6xf32> to vector<2xf32>
    %34 = vector.shape_cast %33 : vector<2xf32> to vector<2x1xf32>
    %35 = vector.broadcast %34 : vector<2x1xf32> to vector<2x6xf32>
    %36 = arith.subf %32, %35 : vector<2x6xf32>
    %37 = math.exp %36 : vector<2x6xf32>
    %cst_18 = arith.constant dense<0.000000e+00> : vector<2xf32>
    %38 = vector.multi_reduction <add>, %37, %cst_18 [1] : vector<2x6xf32> to vector<2xf32>
    %39 = vector.shape_cast %38 : vector<2xf32> to vector<2x1xf32>
    %40 = vector.broadcast %39 : vector<2x1xf32> to vector<2x6xf32>
    %41 = arith.divf %37, %40 : vector<2x6xf32>
    %c0_19 = arith.constant 0 : index
    %c0_20 = arith.constant 0 : index
    %42 = vector.load %arg6[%c0_19, %c0_20] : memref<2x6xf32, #tpu.memory_space<vmem>>, vector<2x6xf32>
    tpu.vector_store %arg6[%c0_19, %c0_20], %41 {strides = array<i32>} : memref<2x6xf32, #tpu.memory_space<vmem>>, vector<2x6xf32>,
    return
  }
  func.func @transform_0(%arg0: i32) -> (i32, i32, i32) {
    %c0_i32 = arith.constant 0 : i32
    %c0_i32_0 = arith.constant 0 : i32
    %c0_i32_1 = arith.constant 0 : i32
    return %arg0, %c0_i32, %c0_i32_0 : i32, i32, i32
  }
  func.func @transform_1(%arg0: i32) -> (i32, i32) {
    %c0_i32 = arith.constant 0 : i32
    %c0_i32_0 = arith.constant 0 : i32
    %c0_i32_1 = arith.constant 0 : i32
    return %c0_i32, %c0_i32_0 : i32, i32
  }
  func.func @transform_2(%arg0: i32) -> (i32, i32) {
    %c0_i32 = arith.constant 0 : i32
    %c0_i32_0 = arith.constant 0 : i32
    %c0_i32_1 = arith.constant 0 : i32
    return %c0_i32, %c0_i32_0 : i32, i32
  }
  func.func @transform_3(%arg0: i32) -> (i32, i32) {
    %c0_i32 = arith.constant 0 : i32
    %c0_i32_0 = arith.constant 0 : i32
    %c0_i32_1 = arith.constant 0 : i32
    return %c0_i32, %c0_i32_0 : i32, i32
  }
  func.func @transform_4(%arg0: i32) -> (i32, i32) {
    %c0_i32 = arith.constant 0 : i32
    %c0_i32_0 = arith.constant 0 : i32
    %c0_i32_1 = arith.constant 0 : i32
    return %c0_i32, %c0_i32_0 : i32, i32
  }
  func.func @transform_5(%arg0: i32) -> (i32, i32) {
    %c0_i32 = arith.constant 0 : i32
    %c0_i32_0 = arith.constant 0 : i32
    return %arg0, %c0_i32 : i32, i32
  }
}

</mosaic_0001>

<bundles_post_ra>
// kernel: tpu_custom_call.1
= control target key start
LH: loop header
LB: loop body
LE: loop exit
PB: predicated region body
PF: predicated region fallthrough
CT: control target
= control target key end

     0   :  { %10 = vsyncpa [#allocation3], 0  ;;  %s767_s0 = inlined_call_operand.hbm [shape: f32[2,32,32], index: 0, kind: input, shape index: {}]   ;;  %s768_s1 = inlined_call_operand.vmem [shape: f32[1,32], index: 1, kind: input, shape index: {}]   ;;  %s769_s2 = inlined_call_operand.vmem [shape: f32[1,32], index: 2, kind: input, shape index: {}]   ;;  %s770_s3 = inlined_call_operand.vmem [shape: f32[32,6], index: 3, kind: input, shape index: {}]   ;;  %s771_s4 = inlined_call_operand.vmem [shape: f32[1,6], index: 4, kind: input, shape index: {}]   ;;  %s772_s5 = inlined_call_operand.hbm [shape: f32[2,6], index: 5, kind: output, shape index: {}]  }
   0x1   :  { %11 = vsyncpa [#allocation4], 0  ;;  %s590_s18 = smov [#allocation2]  }
   0x2   :  { %s17_s19 = sshll.u32 %s590_s18, 4  ;;  %s18_s19 = int_to_ptr.vmem [resolvable:$true] %s17_s19 }
   0x3   :  { %s554_s20 = scalar_lea.vmem %s18_s19, 1024  ;;  %p559_p1 = scmp.lt.s32.totalorder %s18_s19, %s18_s19 }
   0x4   :  { %p555_p0 = scmp.ne.s32.totalorder %s18_s19, %s554_s20  ;;  %p560_p2 = scmp.lt.s32.totalorder %s554_s20, %s554_s20 }
   0x6   :  { %p561_p3 = por %p560_p2, %p559_p1 }
   0x8   :  { %p562_p4 = pnand %p561_p3, %p555_p0 }
   0xa   :  { %565 = shalt.err (!%p562_p4)
}
   0xb   :  { %s591_s21 = smov 128   ;;  %s592_s22 = smov 8  }
   0xc   :  { %23 = dma.hbm_to_vmem [thread:$0]  %s767_s0, 1024, %s18_s19, [#allocation3], %s591_s21, %s591_s21, %s592_s22  }
   0xd   :  { %586 = dma.done.wait [#allocation3], 1024  }
   0xe   :  { %587 = vsyncadd [#allocation3], 4294966272  ;;  %vm43_vm0 = vcmask 261120   ;;  %v39_v0 = vld [vmem:[#allocation2 + $0x20] sm:$0xff]  ;;  %v40_v2 = vld [vmem:[#allocation2 + $0x28] sm:$0xff]  ;;  %v84_v16 = vlaneseq  ;;  %vm95_vm1 = vcmask 130112  }
   0xf   :  { %v35_v1 = vld [vmem:[#allocation2] sm:$0xff]  ;;  %v56_v3 = vsel %vm43_vm0, %v39_v0, 0.0  ;;  %v36_v5 = vld [vmem:[#allocation2 + $0x8] sm:$0xff]  ;;  %v59_v6 = vsel %vm43_vm0, %v40_v2, 0.0  ;;  %v41_v8 = vld [vmem:[#allocation2 + $0x30] sm:$0xff]  ;;  %vm102_vm2 = vcmask 195712  }
  0x10   :  { %v44_v4 = vsel %vm43_vm0, %v35_v1, 0.0  ;;  %57 = vadd.xlane.f32.xlu1 %v56_v3  ;;  %v47_v7 = vsel %vm43_vm0, %v36_v5, 0.0  ;;  %v37_v9 = vld [vmem:[#allocation2 + $0x10] sm:$0xff]  ;;  %v62_v10 = vsel %vm43_vm0, %v41_v8, 0.0  ;;  %v42_v12 = vld [vmem:[#allocation2 + $0x38] sm:$0xff]  ;;  %v85_v19 = vand.u32 127, %v84_v16 }
  0x11   :  { %45 = vadd.xlane.f32.xlu0 %v44_v4  ;;  %v50_v11 = vsel %vm43_vm0, %v37_v9, 0.0  ;;  %v38_v13 = vld [vmem:[#allocation2 + $0x18] sm:$0xff]  ;;  %v65_v14 = vsel %vm43_vm0, %v42_v12, 0.0  ;;  %v638_v21 = vshrl.u32 %v84_v16, 7  ;;  %vm109_vm3 = vcmask 261312   ;;  %s596_s10 = smov [#allocation5]  }
  0x12   :  { %v53_v15 = vsel %vm43_vm0, %v38_v13, 0.0  ;;  %v90_v20 = vadd.s32 4294967288, %v85_v19  ;;  %v97_v24 = vadd.s32 4294967280, %v85_v19  ;;  %v104_v28 = vadd.s32 4294967272, %v85_v19  ;;  %s502_s11 = sshll.u32 %s596_s10, 4  ;;  %s503_s11 = int_to_ptr.vmem [resolvable:$true] %s502_s11 }
  0x13   :  { %v644_v29 = vsub.s32 %v85_v19, %v638_v21  ;;  %vm130_vm4 = vcmask 1041409   ;;  %vm133_vm5 = vcmask 254976   ;;  %v593_v58 = vmov 0   ;;  %p571_p6 = scmp.lt.s32.totalorder %s503_s11, %s503_s11 }
  0x14   :  { %60 = vadd.xlane.f32.xlu1 %v59_v6  ;;  %v641_v25 = vsub.s32 %v90_v20, %v638_v21  ;;  %v647_v30 = vsub.s32 %v97_v24, %v638_v21  ;;  %v652_v39 = vsub.s32 %v104_v28, %v638_v21  ;;  %539 = vset.pattern.permute.xlu0 %v593_v58  ;;  %v142_v59 = vsub.s32 0, %v638_v21 }
  0x15   :  { %48 = vadd.xlane.f32.xlu0 %v47_v7  ;;  %538 = vset.pattern.permute.xlu1 %v593_v58  ;;  %v146_v60 = vsub.s32 1, %v638_v21  ;;  %vm595_vm6 = vmmov 0   ;;  %vm483_vm7 = vcmask 41984  }
  0x18   :  { %63 = vadd.xlane.f32.xlu1 %v62_v10 }
  0x19   :  { %51 = vadd.xlane.f32.xlu0 %v50_v11 }
  0x1c   :  { %66 = vadd.xlane.f32.xlu1 %v65_v14 }
  0x1d   :  { %54 = vadd.xlane.f32.xlu0 %v53_v15 }
  0x99   :  { %v58_v17 = vpop.xlane.xlu1 %57 }
  0x9a   :  { %v46_v18 = vpop.xlane.xlu0 %45  ;;  %v72_v33 = vmul.f32 0.03125, %v58_v17  ;;  %v511_v17 = vld [vmem:[%s768_s1] ss:$0 sm:$0xff] }
  0x9b   :  { %v68_v34 = vmul.f32 0.03125, %v46_v18  ;;  %v512_v18 = vld [vmem:[%s769_s2] ss:$0 sm:$0xff] }
  0x9c   :  { %v114_v44 = vrot.slane %v72_v33, %v644_v29 }
  0x9d   :  { %v61_v22 = vpop.xlane.xlu1 %60  ;;  %v89_v45 = vrot.slane %v68_v34, %v644_v29 }
  0x9e   :  { %v49_v23 = vpop.xlane.xlu0 %48  ;;  %v73_v26 = vmul.f32 0.03125, %v61_v22 }
  0x9f   :  { %v69_v27 = vmul.f32 0.03125, %v49_v23 }
  0xa0   :  { %v118_v37 = vrot.slane %v73_v26, %v641_v25 }
  0xa1   :  { %v64_v31 = vpop.xlane.xlu1 %63  ;;  %v94_v38 = vrot.slane %v69_v27, %v641_v25 }
  0xa2   :  { %v52_v32 = vpop.xlane.xlu0 %51  ;;  %v74_v35 = vmul.f32 0.03125, %v64_v31  ;;  %v119_v48 = vsel %vm95_vm1, %v118_v37, %v114_v44 }
  0xa3   :  { %v70_v36 = vmul.f32 0.03125, %v52_v32  ;;  %v96_v49 = vsel %vm95_vm1, %v94_v38, %v89_v45 }
  0xa4   :  { %v123_v40 = vrot.slane %v74_v35, %v647_v30 }
  0xa5   :  { %v101_v41 = vrot.slane %v70_v36, %v647_v30  ;;  %v67_v42 = vpop.xlane.xlu1 %66 }
  0xa6   :  { %v55_v43 = vpop.xlane.xlu0 %54  ;;  %v75_v46 = vmul.f32 0.03125, %v67_v42  ;;  %v124_v53 = vsel %vm102_vm2, %v123_v40, %v119_v48 }
  0xa7   :  { %v71_v47 = vmul.f32 0.03125, %v55_v43  ;;  %v103_v52 = vsel %vm102_vm2, %v101_v41, %v96_v49 }
  0xa8   :  { %v128_v50 = vrot.slane %v75_v46, %v652_v39 }
  0xa9   :  { %v108_v51 = vrot.slane %v71_v47, %v652_v39 }
  0xaa   :  { %v129_v55 = vsel %vm109_vm3, %v128_v50, %v124_v53 }
  0xab   :  { %v110_v54 = vsel %vm109_vm3, %v108_v51, %v103_v52 }
  0xac   :  { %v131_v56 = vsel %vm130_vm4, %v129_v55, %v110_v54 }
  0xad   :  { %v134_v57 = vsel %vm133_vm5, %v131_v56, 0.0 }
  0xae   :  { %135 = vadd.xlane.f32.xlu0 %v134_v57 }
 0x137   :  { %v136_v61 = vpop.xlane.xlu0 %135 }
 0x138   :  { %v138_v62 = vmul.f32 0.03125, %v136_v61 }
 0x13a   :  { %v143_v63 = vrot.slane %v138_v62, %v142_v59  ;;  %v147_v0 = vrot.slane %v138_v62, %v146_v60 }
 0x13c   :  { %v674_v1 = vsub.f32 %v69_v27, %v143_v63  ;;  %v676_v2 = vsub.f32 %v68_v34, %v143_v63  ;;  %v682_v5 = vsub.f32 %v72_v33, %v147_v0  ;;  %v686_v7 = vsub.f32 %v73_v26, %v147_v0 }
 0x13d   :  { %v690_v9 = vsub.f32 %v70_v36, %v143_v63  ;;  %v156_v11 = vsub.f32 %v74_v35, %v147_v0  ;;  %v694_v13 = vsub.f32 %v71_v47, %v143_v63  ;;  %v157_v15 = vsub.f32 %v75_v46, %v147_v0 }
 0x13e   :  { %v159_v3 = vmul.f32 %v674_v1, %v674_v1  ;;  %v158_v4 = vmul.f32 %v676_v2, %v676_v2  ;;  %v162_v6 = vmul.f32 %v682_v5, %v682_v5  ;;  %v163_v8 = vmul.f32 %v686_v7, %v686_v7 }
 0x13f   :  { %v160_v10 = vmul.f32 %v690_v9, %v690_v9  ;;  %v164_v12 = vmul.f32 %v156_v11, %v156_v11  ;;  %v161_v14 = vmul.f32 %v694_v13, %v694_v13  ;;  %v165_v16 = vmul.f32 %v157_v15, %v157_v15 }
 0x140   :  { %178 = vperm.xlu0 %539, %v159_v3   ;;  %175 = vperm.xlu1 %538, %v158_v4  }
 0x144   :  { %187 = vperm.xlu1 %538, %v162_v6   ;;  %270 = vbcast.lane.b32.xlu0 %v511_v17, 256 }
 0x148   :  { %190 = vperm.xlu1 %538, %v163_v8   ;;  %274 = vbcast.lane.b32.xlu0 %v511_v17, 264 }
 0x14c   :  { %181 = vperm.xlu1 %538, %v160_v10   ;;  %278 = vbcast.lane.b32.xlu0 %v511_v17, 272 }
 0x150   :  { %193 = vperm.xlu1 %538, %v164_v12   ;;  %282 = vbcast.lane.b32.xlu0 %v511_v17, 280 }
 0x154   :  { %184 = vperm.xlu1 %538, %v161_v14   ;;  %303 = vbcast.lane.b32.xlu0 %v512_v18, 256 }
 0x158   :  { %196 = vperm.xlu1 %538, %v165_v16   ;;  %307 = vbcast.lane.b32.xlu0 %v512_v18, 264 }
 0x15c   :  { %311 = vbcast.lane.b32.xlu0 %v512_v18, 272 }
 0x160   :  { %315 = vbcast.lane.b32.xlu0 %v512_v18, 280 }
 0x1bb   :  { %v176_v19 = vpop.permute.xlu1 %175  ;;  %v179_v26 = vpop.permute.xlu0 %178 }
 0x1bc   :  { %v205_v28 = vrot.slane %v179_v26, %v641_v25  ;;  %v201_v31 = vrot.slane %v176_v19, %v644_v29 }
 0x1be   :  { %v206_v38 = vsel %vm95_vm1, %v205_v28, %v201_v31 }
 0x1bf   :  { %v188_v20 = vpop.permute.xlu1 %187  ;;  %v271_v48 = vpop.permute.xlu0 %270 }
 0x1c0   :  { %v220_v35 = vrot.slane %v188_v20, %v644_v29  ;;  %v332_v20 = vld [vmem:[%s770_s3 + $0x18] sm:$0xff] }
 0x1c3   :  { %v191_v22 = vpop.permute.xlu1 %190  ;;  %v275_v49 = vpop.permute.xlu0 %274 }
 0x1c4   :  { %v224_v32 = vrot.slane %v191_v22, %v641_v25  ;;  %v594_v22 = vmov 0.0  }
 0x1c5   :  { %520 = vmatprep.subr.mxu0 %v594_v22  ;;  %528 = vmatprep.mubr.msk.f32.mxu0 %vm595_vm6, %v594_v22 }
 0x1c6   :  { %v225_v40 = vsel %vm95_vm1, %v224_v32, %v220_v35  ;;  %521 = vmatpush3.msra.mxu0 %v332_v20 }
 0x1c7   :  { %v182_v23 = vpop.permute.xlu1 %181  ;;  %v279_v52 = vpop.permute.xlu0 %278  ;;  %522 = vmatprep.subr.mxu0 %v594_v22 }
 0x1c8   :  { %v210_v33 = vrot.slane %v182_v23, %v647_v30 }
 0x1ca   :  { %v211_v42 = vsel %vm102_vm2, %v210_v33, %v206_v38 }
 0x1cb   :  { %v194_v24 = vpop.permute.xlu1 %193  ;;  %v283_v54 = vpop.permute.xlu0 %282 }
 0x1cc   :  { %v229_v34 = vrot.slane %v194_v24, %v647_v30  ;;  %v331_v24 = vld [vmem:[%s770_s3 + $0x10] sm:$0xff] }
 0x1cd   :  { %523 = vmatpush3.msra.mxu0 %v331_v24 }
 0x1ce   :  { %v230_v43 = vsel %vm102_vm2, %v229_v34, %v225_v40  ;;  %524 = vmatprep.subr.mxu0 %v594_v22 }
 0x1cf   :  { %v185_v27 = vpop.permute.xlu1 %184  ;;  %v304_v55 = vpop.permute.xlu0 %303 }
 0x1d0   :  { %v215_v36 = vrot.slane %v185_v27, %v652_v39  ;;  %v329_v27 = vld [vmem:[%s770_s3] sm:$0xff] }
 0x1d2   :  { %v216_v44 = vsel %vm109_vm3, %v215_v36, %v211_v42 }
 0x1d3   :  { %v197_v37 = vpop.permute.xlu1 %196  ;;  %v308_v61 = vpop.permute.xlu0 %307 }
 0x1d4   :  { %v234_v41 = vrot.slane %v197_v37, %v652_v39 }
 0x1d6   :  { %v235_v45 = vsel %vm109_vm3, %v234_v41, %v230_v43 }
 0x1d7   :  { %v236_v46 = vsel %vm130_vm4, %v235_v45, %v216_v44  ;;  %v312_v12 = vpop.permute.xlu0 %311 }
 0x1d8   :  { %v238_v47 = vsel %vm133_vm5, %v236_v46, 0.0 }
 0x1d9   :  { %239 = vadd.xlane.f32.xlu1 %v238_v47 }
 0x1db   :  { %v316_v18 = vpop.permute.xlu0 %315 }
 0x262   :  { %v240_v50 = vpop.xlane.xlu1 %239 }
 0x263   :  { %v241_v51 = vmul.f32 0.03125, %v240_v50 }
 0x265   :  { %v242_v53 = vadd.f32 1e-05, %v241_v51 }
 0x267   :  { %540 = vrsqrt.f32 %v242_v53 }
 0x274   :  { %v541_v56 = vpop.eup %540 }
 0x275   :  { %v248_v57 = vrot.slane %v541_v56, %v142_v59  ;;  %v252_v58 = vrot.slane %v541_v56, %v146_v60 }
 0x277   :  { %v261_v62 = vmul.f32 %v252_v58, %v156_v11  ;;  %v255_v63 = vmul.f32 %v248_v57, %v676_v2  ;;  %v259_v0 = vmul.f32 %v252_v58, %v682_v5  ;;  %v256_v3 = vmul.f32 %v248_v57, %v674_v1 }
 0x278   :  { %v262_v8 = vmul.f32 %v252_v58, %v157_v15  ;;  %v260_v10 = vmul.f32 %v252_v58, %v686_v7  ;;  %v257_v21 = vmul.f32 %v248_v57, %v690_v9  ;;  %v258_v15 = vmul.f32 %v248_v57, %v694_v13  ;;  %v330_v13 = vld [vmem:[%s770_s3 + $0x8] sm:$0xff] }
 0x279   :  { %v288_v4 = vmul.f32 %v271_v48, %v255_v63  ;;  %v289_v6 = vmul.f32 %v275_v49, %v256_v3  ;;  %v294_v14 = vmul.f32 %v279_v52, %v261_v62  ;;  %v292_v16 = vmul.f32 %v271_v48, %v259_v0  ;;  %525 = vmatpush3.msra.mxu0 %v330_v13 }
 0x27a   :  { %v295_v60 = vmul.f32 %v283_v54, %v262_v8  ;;  %v293_v11 = vmul.f32 %v275_v49, %v260_v10  ;;  %v290_v1 = vmul.f32 %v279_v52, %v257_v21  ;;  %v291_v9 = vmul.f32 %v283_v54, %v258_v15  ;;  %526 = vmatprep.subr.mxu0 %v594_v22 }
 0x27b   :  { %v321_v59 = vadd.f32 %v304_v55, %v288_v4  ;;  %v322_v17 = vadd.f32 %v308_v61, %v289_v6  ;;  %v325_v2 = vadd.f32 %v304_v55, %v292_v16  ;;  %v327_v5 = vadd.f32 %v312_v12, %v294_v14  ;;  %527 = vmatpush3.msra.mxu0 %v329_v27 }
 0x27c   :  { %v326_v7 = vadd.f32 %v308_v61, %v293_v11  ;;  %v328_v19 = vadd.f32 %v316_v18, %v295_v60  ;;  %v323_v23 = vadd.f32 %v312_v12, %v290_v1  ;;  %v324_v26 = vadd.f32 %v316_v18, %v291_v9 }
 0x27d   :  { %352 = vperm.xlu0 %539, %v322_v17   ;;  %349 = vperm.xlu1 %538, %v321_v59  }
 0x281   :  { %361 = vperm.xlu0 %539, %v325_v2   ;;  %367 = vperm.xlu1 %538, %v327_v5  }
 0x285   :  { %364 = vperm.xlu0 %539, %v326_v7   ;;  %370 = vperm.xlu1 %538, %v328_v19  }
 0x289   :  { %355 = vperm.xlu0 %539, %v323_v23  }
 0x28d   :  { %358 = vperm.xlu0 %539, %v324_v26  }
 0x2f8   :  { %v353_v28 = vpop.permute.xlu0 %352  ;;  %v350_v31 = vpop.permute.xlu1 %349 }
 0x2f9   :  { %v379_v38 = vrot.slane %v353_v28, %v641_v25  ;;  %v375_v40 = vrot.slane %v350_v31, %v644_v29 }
 0x2fb   :  { %v380_v47 = vsel %vm95_vm1, %v379_v38, %v375_v40 }
 0x2fc   :  { %v362_v32 = vpop.permute.xlu0 %361  ;;  %v368_v33 = vpop.permute.xlu1 %367 }
 0x2fd   :  { %v394_v36 = vrot.slane %v362_v32, %v644_v29  ;;  %v403_v42 = vrot.slane %v368_v33, %v647_v30 }
 0x300   :  { %v365_v34 = vpop.permute.xlu0 %364  ;;  %v371_v43 = vpop.permute.xlu1 %370 }
 0x301   :  { %v398_v35 = vrot.slane %v365_v34, %v641_v25  ;;  %v408_v48 = vrot.slane %v371_v43, %v652_v39 }
 0x303   :  { %v399_v41 = vsel %vm95_vm1, %v398_v35, %v394_v36 }
 0x304   :  { %v356_v37 = vpop.permute.xlu0 %355  ;;  %v404_v45 = vsel %vm102_vm2, %v403_v42, %v399_v41 }
 0x305   :  { %v384_v44 = vrot.slane %v356_v37, %v647_v30  ;;  %v409_v29 = vsel %vm109_vm3, %v408_v48, %v404_v45  ;;  %v513_v30 = vld [vmem:[%s771_s4] ss:$0 sm:$0xff]  ;;  %s566_s4 = scalar_lea.vmem %s503_s11, 32 }
 0x306   :  { %p567_p5 = scmp.ne.s32.totalorder %s503_s11, %s566_s4  ;;  %p572_p7 = scmp.lt.s32.totalorder %s566_s4, %s566_s4 }
 0x307   :  { %v385_v25 = vsel %vm102_vm2, %v384_v44, %v380_v47 }
 0x308   :  { %v359_v46 = vpop.permute.xlu0 %358  ;;  %p573_p8 = por %p572_p7, %p571_p6 }
 0x309   :  { %v389_v49 = vrot.slane %v359_v46, %v652_v39 }
 0x30a   :  { %p574_p9 = pnand %p573_p8, %p567_p5 }
 0x30b   :  { %v390_v50 = vsel %vm109_vm3, %v389_v49, %v385_v25 }
 0x30c   :  { %v410_v51 = vsel %vm130_vm4, %v409_v29, %v390_v50 }
 0x30d   :  { %529 = vmatmul.mubr.msk.f32.vlgmr.msra.gmra.mxu0 %vm43_vm0, %v410_v51 }
 0x3cd   :  { %v479_v52 = vpop.f32.mrf.mxu0 }
 0x3ce   :  { %v480_v53 = vadd.f32 %v513_v30, %v479_v52 }
 0x3cf   :  { %v530_v54 = vpop.f32.mrf.mxu0 }
 0x3d0   :  { %v484_v39 = vsel %vm483_vm7, %v480_v53, -inf }
 0x3d1   :  { %485 = vmax.xlane.f32.xlu0 %v484_v39 }
 0x45a   :  { %v486_v55 = vpop.xlane.xlu0 %485 }
 0x45b   :  { %v487_v56 = vsub.f32 %v480_v53, %v486_v55 }
 0x45d   :  { %v488_v57 = vmul.f32 1.442695, %v487_v56 }
 0x45f   :  { %542 = vpow2.f32 %v488_v57 }
 0x46c   :  { %v543_v58 = vpop.eup %542 }
 0x46d   :  { %v490_v61 = vsel %vm483_vm7, %v543_v58, 0.0 }
 0x46e   :  { %491 = vadd.xlane.f32.xlu1 %v490_v61 }
 0x4f7   :  { %v492_v62 = vpop.xlane.xlu1 %491 }
 0x4f8   :  { %544 = vrcp.f32 %v492_v62 }
 0x505   :  { %v545_v63 = vpop.eup %544 }
 0x506   :  { %v494_v0 = vmul.f32 %v545_v63, %v543_v58 }
 0x508   :  { %495 = vst.msk [vmem:[#allocation5] sm:$0x3] %vm483_vm7, %v494_v0 }
 0x509   :  { %577 = shalt.err (!%p574_p9)
}
 0x50a   :  { %505 = dma.vmem_to_hbm [thread:$0]  %s503_s11, 32, %s772_s5, [#allocation4]  }
 0x50b   :  { %588 = dma.done.wait [#allocation4], 32  }
 0x50c   :  { %589 = vsyncadd [#allocation4], 4294967264 }
 0x50d   :  { %509 = vsyncpa [#allocation3], 1 }
 0x50e   :  { %510 = vsyncpa [#allocation4], 1 }

</bundles_post_ra>
